<compile_context>
chip_gen: v7x
topology: tpu7x:2x2x1
jax: 0.10.0
libtpu: 0.0.40
codegen_flags: <defaults>
</compile_context>

<pallas_src>
import functools

import jax
import jax.numpy as jnp
from jax import lax
from jax.experimental import pallas as pl
from jax.experimental.pallas import tpu as pltpu


def _round_up(n, m):
    return (n + m - 1) // m * m


# ---------------------------------------------------------------------------
# Kernel
# ---------------------------------------------------------------------------
def _mlp_kernel(x_ref,
                w1_ref, b1_ref,
                w2_ref, b2_ref,
                w3_ref, b3_ref,
                w4_ref, b4_ref,
                o_ref):
    # ---- fc1 (+ folded bn1) + relu   (dropout = identity in eval mode) ----
    xb = x_ref[...].astype(jnp.bfloat16)          # raw fp32 in HBM, cast in-kernel
    h = jnp.dot(xb, w1_ref[...], preferred_element_type=jnp.float32)
    h = jnp.maximum(h + b1_ref[...], 0.0)

    # ---- fc2 (+ folded bn2) + relu ----
    h = jnp.dot(h.astype(jnp.bfloat16), w2_ref[...],
                preferred_element_type=jnp.float32)
    h = jnp.maximum(h + b2_ref[...], 0.0)

    # ---- fc3 (+ folded bn3) + relu ----
    h = jnp.dot(h.astype(jnp.bfloat16), w3_ref[...],
                preferred_element_type=jnp.float32)
    h = jnp.maximum(h + b3_ref[...], 0.0)

    # ---- fc4 + sigmoid, lane-dense (1, tb) output ----
    # w4 is (8, 32) bf16 with the real weight vector in row 0 (rows 1..7 zero).
    # Contract the feature axis of both operands so batch lands on the lane axis,
    # then keep only row 0 for the bias/sigmoid/store.
    logits = lax.dot_general(
        w4_ref[...], h.astype(jnp.bfloat16),
        dimension_numbers=(((1,), (1,)), ((), ())),
        preferred_element_type=jnp.float32)        # (8, tb)
    row = logits[0:1, :] + b4_ref[...]             # (1, tb)
    o_ref[...] = 1.0 / (1.0 + jnp.exp(-row))       # exact sigmoid


# ---------------------------------------------------------------------------
# Wrapper
# ---------------------------------------------------------------------------
@functools.partial(jax.jit, static_argnames=("tile_b",))
def heart_disease_nn_forward(x, params, *, tile_b=2048):
    """x: [B, D_in] float32. params: output of prepare_params()."""
    (w1, b1, w2, b2, w3, b3, w4, b4) = params

    B, d_in = x.shape
    h1, h2, h3 = w1.shape[1], w2.shape[1], w3.shape[1]

    # Batch tiling:
    #  - small batches: one 8-aligned tile.
    #  - large batches: 128-aligned tiles of up to `tile_b`, forced to >= 2 tiles so
    #    both v7x TensorCores get work under the "parallel" batch axis.
    b8 = _round_up(B, 8)
    if b8 <= 128:
        tb = b8
    else:
        b128 = _round_up(B, 128)
        tb = min(_round_up(tile_b, 128), b128)
        if b128 // tb < 2 and b128 >= 256:
            tb = _round_up(b128 // 2, 128)
    B_pad = _round_up(B, tb)
    num_tiles = B_pad // tb

    # Pad the batch only (no feature-dim padding, no wrapper-side cast of x).
    if B_pad != B:
        x_in = jnp.zeros((B_pad, d_in), x.dtype).at[:B].set(x)
    else:
        x_in = x

    resident = lambda i: (0, 0)   # weights/biases: same block every grid step

    out = pl.pallas_call(
        _mlp_kernel,
        out_shape=jax.ShapeDtypeStruct((1, B_pad), jnp.float32),
        grid_spec=pltpu.PrefetchScalarGridSpec(
            num_scalar_prefetch=0,
            grid=(num_tiles,),
            in_specs=[
                pl.BlockSpec((tb, d_in), lambda i: (i, 0)),   # x tile (raw fp32)
                pl.BlockSpec((d_in, h1), resident),           # w1' (bf16)
                pl.BlockSpec((1, h1), resident),              # b1' (f32)
                pl.BlockSpec((h1, h2), resident),             # w2'
                pl.BlockSpec((1, h2), resident),              # b2'
                pl.BlockSpec((h2, h3), resident),             # w3'
                pl.BlockSpec((1, h3), resident),              # b3'
                pl.BlockSpec((8, h3), resident),              # w4 (row 0 real, bf16)
                pl.BlockSpec((1, 1), resident),               # b4
            ],
            out_specs=pl.BlockSpec((1, tb), lambda i: (0, i)),
        ),
        compiler_params=pltpu.CompilerParams(
            dimension_semantics=("parallel",),
            vmem_limit_bytes=32 * 1024 * 1024),
    )(x_in, w1, b1, w2, b2, w3, b3, w4, b4)

    # Row 0 holds the real outputs; back to the module's (B, 1) layout.
    return out[0, :B].reshape(B, 1)


# ---------------------------------------------------------------------------
# Parameters
# ---------------------------------------------------------------------------
def init_params(key, input_dim):
    """Raw params mirroring the PyTorch module (eval mode, fresh BN stats).

    Linear weights are stored pre-transposed as [fan_in, fan_out]; biases as
    [1, fan_out]. BatchNorm params are per-feature rows [1, fan_out].
    """
    dims = [(input_dim, 128), (128, 64), (64, 32), (32, 1)]
    keys = jax.random.split(key, 2 * len(dims))
    raw = {}
    for li, (fan_in, fan_out) in enumerate(dims, start=1):
        bound = 1.0 / jnp.sqrt(jnp.float32(fan_in))
        raw[f"fc{li}_w"] = jax.random.uniform(
            keys[2 * (li - 1)], (fan_in, fan_out),
            minval=-bound, maxval=bound, dtype=jnp.float32)
        raw[f"fc{li}_b"] = jax.random.uniform(
            keys[2 * (li - 1) + 1], (1, fan_out),
            minval=-bound, maxval=bound, dtype=jnp.float32)
        if li <= 3:
            raw[f"bn{li}_gamma"] = jnp.ones((1, fan_out), jnp.float32)
            raw[f"bn{li}_beta"] = jnp.zeros((1, fan_out), jnp.float32)
            raw[f"bn{li}_mean"] = jnp.zeros((1, fan_out), jnp.float32)
            raw[f"bn{li}_var"] = jnp.ones((1, fan_out), jnp.float32)
    return raw


def prepare_params(raw, eps=1e-5):
    """Fold eval-mode BN + bias into each layer's weight/bias, cast to bf16."""
    prepared = []
    for li in (1, 2, 3):
        w = raw[f"fc{li}_w"]
        b = raw[f"fc{li}_b"]
        scale = raw[f"bn{li}_gamma"] / jnp.sqrt(raw[f"bn{li}_var"] + eps)
        shift = raw[f"bn{li}_beta"] - raw[f"bn{li}_mean"] * scale
        prepared.append((w * scale).astype(jnp.bfloat16))        # scale output cols
        prepared.append((b * scale + shift).astype(jnp.float32))
    # fc4: pad to 8 sublanes (row 0 real) so the kernel can contract feature axes.
    w4 = raw["fc4_w"]                                            # (32, 1)
    w4_rows = jnp.zeros((8, w4.shape[0]), jnp.float32).at[0, :].set(w4[:, 0])
    prepared.append(w4_rows.astype(jnp.bfloat16))
    prepared.append(raw["fc4_b"].reshape(1, 1).astype(jnp.float32))
    return tuple(prepared)


def reference_forward(x, raw, eps=1e-5):
    """Pure-JAX fp32 reference (eval-mode BN, identity dropout)."""
    h = x
    for li in (1, 2, 3):
        h = h @ raw[f"fc{li}_w"] + raw[f"fc{li}_b"]
        h = (h - raw[f"bn{li}_mean"]) / jnp.sqrt(raw[f"bn{li}_var"] + eps)
        h = h * raw[f"bn{li}_gamma"] + raw[f"bn{li}_beta"]
        h = jnp.maximum(h, 0.0)
    z = h @ raw["fc4_w"] + raw["fc4_b"]
    return 1.0 / (1.0 + jnp.exp(-z))


if __name__ == "__main__":
    key = jax.random.PRNGKey(0)
    k_x, k_p = jax.random.split(key)

    batch, input_dim = 8, 16
    x = jax.random.normal(k_x, (batch, input_dim), dtype=jnp.float32)

    raw = init_params(k_p, input_dim)
    params = prepare_params(raw)

    out = heart_disease_nn_forward(x, params)
    out = jax.block_until_ready(out)

    ref = reference_forward(x, raw)
    assert out.shape == (batch, 1)
    assert jnp.allclose(out, ref, atol=2e-2, rtol=0.0), "mismatch vs reference"

    print("KERNEL_OK")
</pallas_src>

<mosaic_0001>
module attributes {stable_mosaic.version = 11 : i64} {
  func.func @_mlp_kernel(%arg0: i32, %arg1: memref<8x16xf32, #tpu.memory_space<vmem>>, %arg2: memref<16x128xbf16, #tpu.memory_space<vmem>>, %arg3: memref<1x128xf32, #tpu.memory_space<vmem>>, %arg4: memref<128x64xbf16, #tpu.memory_space<vmem>>, %arg5: memref<1x64xf32, #tpu.memory_space<vmem>>, %arg6: memref<64x32xbf16, #tpu.memory_space<vmem>>, %arg7: memref<1x32xf32, #tpu.memory_space<vmem>>, %arg8: memref<8x32xbf16, #tpu.memory_space<vmem>>, %arg9: memref<1x1xf32, #tpu.memory_space<vmem>>, %arg10: memref<1x8xf32, #tpu.memory_space<vmem>>) attributes {dimension_semantics = [#tpu.dimension_semantics<parallel>], iteration_bounds = array<i64: 1>, scalar_prefetch = 0 : i64, scratch_operands = 0 : i64, tpu.core_type = #tpu.core_type<tc>, window_params = [{transform_indices = @transform_0, window_bounds = array<i64: 8, 16>}, {pipeline_mode = #tpu.pipeline_mode<synchronous>, transform_indices = @transform_1, window_bounds = array<i64: 16, 128>}, {pipeline_mode = #tpu.pipeline_mode<synchronous>, transform_indices = @transform_2, window_bounds = array<i64: 1, 128>}, {pipeline_mode = #tpu.pipeline_mode<synchronous>, transform_indices = @transform_3, window_bounds = array<i64: 128, 64>}, {pipeline_mode = #tpu.pipeline_mode<synchronous>, transform_indices = @transform_4, window_bounds = array<i64: 1, 64>}, {pipeline_mode = #tpu.pipeline_mode<synchronous>, transform_indices = @transform_5, window_bounds = array<i64: 64, 32>}, {pipeline_mode = #tpu.pipeline_mode<synchronous>, transform_indices = @transform_6, window_bounds = array<i64: 1, 32>}, {pipeline_mode = #tpu.pipeline_mode<synchronous>, transform_indices = @transform_7, window_bounds = array<i64: 8, 32>}, {pipeline_mode = #tpu.pipeline_mode<synchronous>, transform_indices = @transform_8, window_bounds = array<i64: 1, 1>}, {transform_indices = @transform_9, window_bounds = array<i64: 1, 8>}]} {
    %c0 = arith.constant 0 : index
    %c0_0 = arith.constant 0 : index
    %0 = vector.load %arg1[%c0, %c0_0] : memref<8x16xf32, #tpu.memory_space<vmem>>, vector<8x16xf32>
    %1 = arith.truncf %0 : vector<8x16xf32> to vector<8x16xbf16>
    %c0_1 = arith.constant 0 : index
    %c0_2 = arith.constant 0 : index
    %2 = vector.load %arg2[%c0_1, %c0_2] : memref<16x128xbf16, #tpu.memory_space<vmem>>, vector<16x128xbf16>
    %cst = arith.constant dense<0.000000e+00> : vector<8x128xf32>
    %3 = tpu.matmul %1, %2, %cst {dimension_numbers = #tpu.dot_dimension_numbers<[1], [0], [0], [1], [0, 0, 1, 1], [], []>} : vector<8x16xbf16>, vector<16x128xbf16>, vector<8x128xf32> -> vector<8x128xf32>
    %c0_3 = arith.constant 0 : index
    %c0_4 = arith.constant 0 : index
    %4 = vector.load %arg3[%c0_3, %c0_4] : memref<1x128xf32, #tpu.memory_space<vmem>>, vector<1x128xf32>
    %5 = vector.broadcast %4 : vector<1x128xf32> to vector<8x128xf32>
    %6 = arith.addf %3, %5 : vector<8x128xf32>
    %cst_5 = arith.constant 0.000000e+00 : f32
    %7 = vector.broadcast %cst_5 : f32 to vector<8x128xf32>
    %8 = arith.maximumf %6, %7 : vector<8x128xf32>
    %9 = arith.truncf %8 : vector<8x128xf32> to vector<8x128xbf16>
    %c0_6 = arith.constant 0 : index
    %c0_7 = arith.constant 0 : index
    %10 = vector.load %arg4[%c0_6, %c0_7] : memref<128x64xbf16, #tpu.memory_space<vmem>>, vector<128x64xbf16>
    %cst_8 = arith.constant dense<0.000000e+00> : vector<8x64xf32>
    %11 = tpu.matmul %9, %10, %cst_8 {dimension_numbers = #tpu.dot_dimension_numbers<[1], [0], [0], [1], [0, 0, 1, 1], [], []>} : vector<8x128xbf16>, vector<128x64xbf16>, vector<8x64xf32> -> vector<8x64xf32>
    %c0_9 = arith.constant 0 : index
    %c0_10 = arith.constant 0 : index
    %12 = vector.load %arg5[%c0_9, %c0_10] : memref<1x64xf32, #tpu.memory_space<vmem>>, vector<1x64xf32>
    %13 = vector.broadcast %12 : vector<1x64xf32> to vector<8x64xf32>
    %14 = arith.addf %11, %13 : vector<8x64xf32>
    %cst_11 = arith.constant 0.000000e+00 : f32
    %15 = vector.broadcast %cst_11 : f32 to vector<8x64xf32>
    %16 = arith.maximumf %14, %15 : vector<8x64xf32>
    %17 = arith.truncf %16 : vector<8x64xf32> to vector<8x64xbf16>
    %c0_12 = arith.constant 0 : index
    %c0_13 = arith.constant 0 : index
    %18 = vector.load %arg6[%c0_12, %c0_13] : memref<64x32xbf16, #tpu.memory_space<vmem>>, vector<64x32xbf16>
    %cst_14 = arith.constant dense<0.000000e+00> : vector<8x32xf32>
    %19 = tpu.matmul %17, %18, %cst_14 {dimension_numbers = #tpu.dot_dimension_numbers<[1], [0], [0], [1], [0, 0, 1, 1], [], []>} : vector<8x64xbf16>, vector<64x32xbf16>, vector<8x32xf32> -> vector<8x32xf32>
    %c0_15 = arith.constant 0 : index
    %c0_16 = arith.constant 0 : index
    %20 = vector.load %arg7[%c0_15, %c0_16] : memref<1x32xf32, #tpu.memory_space<vmem>>, vector<1x32xf32>
    %21 = vector.broadcast %20 : vector<1x32xf32> to vector<8x32xf32>
    %22 = arith.addf %19, %21 : vector<8x32xf32>
    %cst_17 = arith.constant 0.000000e+00 : f32
    %23 = vector.broadcast %cst_17 : f32 to vector<8x32xf32>
    %24 = arith.maximumf %22, %23 : vector<8x32xf32>
    %c0_18 = arith.constant 0 : index
    %c0_19 = arith.constant 0 : index
    %25 = vector.load %arg8[%c0_18, %c0_19] : memref<8x32xbf16, #tpu.memory_space<vmem>>, vector<8x32xbf16>
    %26 = arith.truncf %24 : vector<8x32xf32> to vector<8x32xbf16>
    %cst_20 = arith.constant dense<0.000000e+00> : vector<8x8xf32>
    %27 = tpu.matmul %25, %26, %cst_20 {dimension_numbers = #tpu.dot_dimension_numbers<[1], [1], [0], [0], [0, 0, 1, 0], [], []>} : vector<8x32xbf16>, vector<8x32xbf16>, vector<8x8xf32> -> vector<8x8xf32>
    %28 = vector.extract_strided_slice %27 {offsets = [0, 0], sizes = [1, 8], strides = [1, 1]} : vector<8x8xf32> to vector<1x8xf32>
    %c0_21 = arith.constant 0 : index
    %c0_22 = arith.constant 0 : index
    %29 = vector.load %arg9[%c0_21, %c0_22] : memref<1x1xf32, #tpu.memory_space<vmem>>, vector<1x1xf32>
    %30 = vector.broadcast %29 : vector<1x1xf32> to vector<1x8xf32>
    %31 = arith.addf %28, %30 : vector<1x8xf32>
    %cst_23 = arith.constant 0.000000e+00 : f32
    %32 = vector.broadcast %cst_23 : f32 to vector<1x8xf32>
    %33 = arith.subf %32, %31 : vector<1x8xf32>
    %34 = math.exp %33 : vector<1x8xf32>
    %cst_24 = arith.constant 1.000000e+00 : f32
    %35 = vector.broadcast %cst_24 : f32 to vector<1x8xf32>
    %36 = arith.addf %35, %34 : vector<1x8xf32>
    %cst_25 = arith.constant 1.000000e+00 : f32
    %37 = vector.broadcast %cst_25 : f32 to vector<1x8xf32>
    %38 = arith.divf %37, %36 : vector<1x8xf32>
    %c0_26 = arith.constant 0 : index
    %c0_27 = arith.constant 0 : index
    %39 = vector.load %arg10[%c0_26, %c0_27] : memref<1x8xf32, #tpu.memory_space<vmem>>, vector<1x8xf32>
    tpu.vector_store %arg10[%c0_26, %c0_27], %38 {strides = array<i32>} : memref<1x8xf32, #tpu.memory_space<vmem>>, vector<1x8xf32>,
    return
  }
  func.func @transform_0(%arg0: i32) -> (i32, i32) {
    %c0_i32 = arith.constant 0 : i32
    %c0_i32_0 = arith.constant 0 : i32
    return %arg0, %c0_i32 : i32, i32
  }
  func.func @transform_1(%arg0: i32) -> (i32, i32) {
    %c0_i32 = arith.constant 0 : i32
    %c0_i32_0 = arith.constant 0 : i32
    %c0_i32_1 = arith.constant 0 : i32
    return %c0_i32, %c0_i32_0 : i32, i32
  }
  func.func @transform_2(%arg0: i32) -> (i32, i32) {
    %c0_i32 = arith.constant 0 : i32
    %c0_i32_0 = arith.constant 0 : i32
    %c0_i32_1 = arith.constant 0 : i32
    return %c0_i32, %c0_i32_0 : i32, i32
  }
  func.func @transform_3(%arg0: i32) -> (i32, i32) {
    %c0_i32 = arith.constant 0 : i32
    %c0_i32_0 = arith.constant 0 : i32
    %c0_i32_1 = arith.constant 0 : i32
    return %c0_i32, %c0_i32_0 : i32, i32
  }
  func.func @transform_4(%arg0: i32) -> (i32, i32) {
    %c0_i32 = arith.constant 0 : i32
    %c0_i32_0 = arith.constant 0 : i32
    %c0_i32_1 = arith.constant 0 : i32
    return %c0_i32, %c0_i32_0 : i32, i32
  }
  func.func @transform_5(%arg0: i32) -> (i32, i32) {
    %c0_i32 = arith.constant 0 : i32
    %c0_i32_0 = arith.constant 0 : i32
    %c0_i32_1 = arith.constant 0 : i32
    return %c0_i32, %c0_i32_0 : i32, i32
  }
  func.func @transform_6(%arg0: i32) -> (i32, i32) {
    %c0_i32 = arith.constant 0 : i32
    %c0_i32_0 = arith.constant 0 : i32
    %c0_i32_1 = arith.constant 0 : i32
    return %c0_i32, %c0_i32_0 : i32, i32
  }
  func.func @transform_7(%arg0: i32) -> (i32, i32) {
    %c0_i32 = arith.constant 0 : i32
    %c0_i32_0 = arith.constant 0 : i32
    %c0_i32_1 = arith.constant 0 : i32
    return %c0_i32, %c0_i32_0 : i32, i32
  }
  func.func @transform_8(%arg0: i32) -> (i32, i32) {
    %c0_i32 = arith.constant 0 : i32
    %c0_i32_0 = arith.constant 0 : i32
    %c0_i32_1 = arith.constant 0 : i32
    return %c0_i32, %c0_i32_0 : i32, i32
  }
  func.func @transform_9(%arg0: i32) -> (i32, i32) {
    %c0_i32 = arith.constant 0 : i32
    %c0_i32_0 = arith.constant 0 : i32
    return %c0_i32, %arg0 : i32, i32
  }
}

</mosaic_0001>

<bundles_post_ra>
// kernel: heart_disease_nn_forward.1
= control target key start
LH: loop header
LB: loop body
LE: loop exit
PB: predicated region body
PF: predicated region fallthrough
CT: control target
= control target key end

     0   :  { %s650_s0 = inlined_call_operand.vmem [shape: f32[8,16], index: 0, kind: input, shape index: {}]   ;;  %s651_s1 = inlined_call_operand.vmem [shape: bf16[16,128], index: 1, kind: input, shape index: {}]   ;;  %s652_s2 = inlined_call_operand.vmem [shape: f32[1,128], index: 2, kind: input, shape index: {}]   ;;  %s653_s3 = inlined_call_operand.vmem [shape: bf16[128,64], index: 3, kind: input, shape index: {}]   ;;  %s654_s4 = inlined_call_operand.vmem [shape: f32[1,64], index: 4, kind: input, shape index: {}]   ;;  %s655_s5 = inlined_call_operand.vmem [shape: bf16[64,32], index: 5, kind: input, shape index: {}]   ;;  %s656_s6 = inlined_call_operand.vmem [shape: f32[1,32], index: 6, kind: input, shape index: {}]   ;;  %s657_s7 = inlined_call_operand.vmem [shape: bf16[8,32], index: 7, kind: input, shape index: {}]   ;;  %s658_s8 = inlined_call_operand.<no memory space> [shape: f32[1,1], index: 8, kind: input, shape index: {}]   ;;  %s659_s9 = inlined_call_operand.hbm [shape: f32[1,8], index: 9, kind: output, shape index: {}]  }
   0x1   :  { %v14_v0 = vstv %s658_s8 }
   0x2   :  { %15 = vst [vmem:[#allocation2] sm:$0x1] %v14_v0 }
   0x3   :  { %v464_v1 = vld [vmem:[%s651_s1] sm:$0xff]   ;;  %v505_v2 = vmov 0.0   ;;  %vm53_vm0 = vcmask 130048   ;;  %vm506_vm1 = vmmov 0   ;;  %v466_v6 = vld [vmem:[%s653_s3 + $0x8] sm:$0xff]   ;;  %v467_v7 = vld [vmem:[%s653_s3 + $0x10] sm:$0xff]  }
   0x4   :  { %415 = vmatprep.subr.bf16.mxu0 %v505_v2  ;;  %v36_v3 = vld [vmem:[%s650_s0] sm:$0xff]  ;;  %421 = vmatprep.subr.bf16.mxu1 %v505_v2  ;;  %v468_v8 = vld [vmem:[%s653_s3 + $0x18] sm:$0xff]  }
   0x5   :  { %v465_v4 = vld [vmem:[%s653_s3] sm:$0xff]   ;;  %416 = vmatpush3.bf16.msra.mxu0 %v464_v1  ;;  %417 = vmatprep.mubr.msk.bf16.mxu0 %vm506_vm1, %v505_v2  ;;  %v37_v5 = vpack.c.bf16 %v36_v3, %v36_v3 }
   0x6   :  { %422 = vmatpush3.bf16.msra.mxu1 %v465_v4  ;;  %437 = vmatprep.mubr.msk.bf16.mxu1 %vm506_vm1, %v505_v2 }
   0x7   :  { %423 = vmatprep.subr.bf16.mxu1 %v505_v2  ;;  %441 = vmatprep.subr.bf16.mxu0 %v505_v2 }
   0x8   :  { %418 = vmatmul.mubr.msk.bf16.vlgmr.msra.gmra.mrb[0].mxu0 %vm53_vm0, %v37_v5 }
   0x9   :  { %449 = vmatprep.mubr.msk.bf16.mxu0 %vm506_vm1, %v505_v2 }
   0xa   :  { %424 = vmatpush3.bf16.msra.mxu1 %v466_v6 }
   0xb   :  { %425 = vmatprep.subr.bf16.mxu1 %v505_v2 }
   0xe   :  { %426 = vmatpush3.bf16.msra.mxu1 %v467_v7 }
   0xf   :  { %16 = vsyncpa [#allocation4], 0  ;;  %427 = vmatprep.subr.bf16.mxu1 %v505_v2  ;;  %v469_v9 = vld [vmem:[%s653_s3 + $0x20] sm:$0xff]   ;;  %v470_v10 = vld [vmem:[%s653_s3 + $0x28] sm:$0xff]   ;;  %vm251_vm2 = vcmask 523264   ;;  %v507_v34 = vmov 0   ;;  %v351_v45 = vlaneseq }
  0x10   :  { %v471_v11 = vld [vmem:[%s653_s3 + $0x30] sm:$0xff]   ;;  %v472_v12 = vld [vmem:[%s653_s3 + $0x38] sm:$0xff]   ;;  %v473_v13 = vld [vmem:[%s655_s5] sm:$0xff]   ;;  %463 = vset.pattern.permute.xlu0 %v507_v34  ;;  %vm298_vm3 = vcmask 261120   ;;  %vm362_vm4 = vcmask 57344  }
  0x11   :  { %442 = vmatpush3.bf16.msra.mxu0 %v473_v13  ;;  %v474_v14 = vld [vmem:[%s655_s5 + $0x8] sm:$0xff]   ;;  %v378_v15 = vld [vmem:[%s652_s2] ss:$0 sm:$0xff]  ;;  %v475_v23 = vld [vmem:[%s655_s5 + $0x10] sm:$0xff]   ;;  %v352_v46 = vshrl.u32 %v351_v45, 7 }
  0x12   :  { %428 = vmatpush3.bf16.msra.mxu1 %v468_v8  ;;  %443 = vmatprep.subr.bf16.mxu0 %v505_v2  ;;  %v476_v24 = vld [vmem:[%s655_s5 + $0x18] sm:$0xff]   ;;  %v381_v25 = vld [vmem:[%s654_s4] ss:$0 sm:$0xff] }
  0x13   :  { %429 = vmatprep.subr.bf16.mxu1 %v505_v2  ;;  %v345_v33 = vld [vmem:[#allocation2] sm:$0x1]  ;;  %v353_v47 = vsub.s32 0, %v352_v46 }
  0x14   :  { %348 = vperm.xlu0 %463, %v345_v33   ;;  %v390_v35 = vld [vmem:[%s656_s6] ss:$0 sm:$0xff]  ;;  %s508_s6 = smov [#allocation3]  }
  0x15   :  { %444 = vmatpush3.bf16.msra.mxu0 %v474_v14  ;;  %v296_v44 = vld [vmem:[%s657_s7] sm:$0xf]  ;;  %s370_s0 = sshll.u32 %s508_s6, 4  ;;  %s371_s0 = int_to_ptr.vmem [resolvable:$true] %s370_s0 }
  0x16   :  { %430 = vmatpush3.bf16.msra.mxu1 %v469_v9  ;;  %445 = vmatprep.subr.bf16.mxu0 %v505_v2  ;;  %s481_s7 = scalar_lea.vmem %s371_s0, 16  ;;  %s485_s17 = scalar_lea.vmem %s371_s0, 32 }
  0x17   :  { %431 = vmatprep.subr.bf16.mxu1 %v505_v2  ;;  %p482_p0 = scmp.ne.s32.totalorder %s371_s0, %s481_s7  ;;  %p486_p1 = scmp.lt.s32.totalorder %s371_s0, %s371_s0 }
  0x18   :  { %p487_p2 = scmp.lt.s32.totalorder %s485_s17, %s481_s7 }
  0x19   :  { %446 = vmatpush3.bf16.msra.mxu0 %v475_v23 }
  0x1a   :  { %432 = vmatpush3.bf16.msra.mxu1 %v470_v10  ;;  %447 = vmatprep.subr.bf16.mxu0 %v505_v2  ;;  %p488_p3 = por %p487_p2, %p486_p1 }
  0x1b   :  { %433 = vmatprep.subr.bf16.mxu1 %v505_v2 }
  0x1c   :  { %p489_p4 = pnand %p488_p3, %p482_p0 }
  0x1d   :  { %448 = vmatpush3.bf16.msra.mxu0 %v476_v24 }
  0x1e   :  { %434 = vmatpush3.bf16.msra.mxu1 %v471_v11  ;;  %453 = vmatprep.subr.bf16.mxu0 %v505_v2 }
  0x1f   :  { %435 = vmatprep.subr.bf16.mxu1 %v505_v2 }
  0x22   :  { %436 = vmatpush3.bf16.msra.mxu1 %v472_v12 }
  0x93   :  { %v349_v48 = vpop.permute.xlu0 %348 }
  0x94   :  { %v354_v49 = vrot.slane %v349_v48, %v353_v47 }
  0xdb   :  { %v91_v16 = vpop.f32.mrb[0].mxu0 }
  0xdc   :  { %v92_v17 = vadd.f32 %v378_v15, %v91_v16  ;;  %v419_v18 = vpop.f32.mrb[1].mxu0 }
  0xdd   :  { %v94_v19 = vpop.f32.mrb[2].mxu0 }
  0xde   :  { %v97_v20 = vmax.f32 %v92_v17, 0.0  ;;  %v420_v21 = vpop.f32.mrb[3].mxu0 }
  0xe0   :  { %v98_v22 = vpack.c.bf16 %v97_v20, %v97_v20 }
  0xe2   :  { %438 = vmatmul.mubr.bf16.vlgmr.msra.gmra.mrb[0].mxu1 %v98_v22 }
 0x1b5   :  { %v204_v26 = vpop.f32.mrb[0].mxu1 }
 0x1b6   :  { %v205_v27 = vadd.f32 %v381_v25, %v204_v26  ;;  %v439_v28 = vpop.f32.mrb[1].mxu1 }
 0x1b7   :  { %v207_v29 = vpop.f32.mrb[2].mxu1 }
 0x1b8   :  { %v210_v30 = vmax.f32 %v205_v27, 0.0  ;;  %v440_v31 = vpop.f32.mrb[3].mxu1 }
 0x1ba   :  { %v211_v32 = vpack.c.bf16 %v210_v30, %v210_v30 }
 0x1bc   :  { %450 = vmatmul.mubr.msk.bf16.vlgmr.msra.gmra.mrb[4].mxu0 %vm251_vm2, %v211_v32 }
 0x1bd   :  { %455 = vmatprep.mubr.msk.bf16.mxu0 %vm506_vm1, %v505_v2 }
 0x28f   :  { %v289_v36 = vpop.f32.mrb[4].mxu0 }
 0x290   :  { %v290_v37 = vadd.f32 %v390_v35, %v289_v36  ;;  %v451_v38 = vpop.f32.mrb[5].mxu0 }
 0x291   :  { %v292_v39 = vpop.f32.mrb[6].mxu0 }
 0x292   :  { %v295_v40 = vmax.f32 %v290_v37, 0.0  ;;  %v452_v41 = vpop.f32.mrb[7].mxu0 }
 0x294   :  { %v297_v42 = vpack.c.bf16 %v295_v40, %v295_v40 }
 0x296   :  { %v303_v43 = vsel %vm298_vm3, %v297_v42, 0 }
 0x297   :  { %454 = vmatpush3.bf16.xpose.msra.mxu0 %v303_v43 }
 0x29e   :  { %456 = vmatmul.mubr.msk.bf16.vlgmr.msra.gmra.mrb[8].mxu0 %vm298_vm3, %v296_v44 }
 0x371   :  { %v339_v50 = vpop.f32.mrb[8].mxu0 }
 0x372   :  { %v355_v51 = vadd.f32 %v354_v49, %v339_v50  ;;  %v457_v52 = vpop.f32.mrb[9].mxu0 }
 0x373   :  { %v342_v53 = vpop.f32.mrb[10].mxu0 }
 0x374   :  { %v356_v54 = vsub.f32 0.0, %v355_v51  ;;  %v458_v55 = vpop.f32.mrb[11].mxu0 }
 0x376   :  { %v357_v56 = vmul.f32 1.442695, %v356_v54 }
 0x378   :  { %477 = vpow2.f32 %v357_v56 }
 0x382   :  { %v478_v57 = vpop.eup %477 }
 0x383   :  { %v359_v58 = vadd.f32 1.0, %v478_v57 }
 0x385   :  { %479 = vrcp.f32 %v359_v58 }
 0x38f   :  { %v480_v59 = vpop.eup %479 }
 0x390   :  { %363 = vst.msk [vmem:[#allocation3] sm:$0x1] %vm362_vm4, %v480_v59 }
 0x391   :  { %492 = shalt.err (!%p489_p4)
}
 0x392   :  { %s493_s20 = scalar_lea.hbm %s659_s9, 16 }
 0x393   :  { %p494_p5 = scmp.ne.s32.totalorder %s659_s9, %s493_s20  ;;  %p497_p6 = scmp.lt.u32.totalorder %s493_s20, %s659_s9 }
 0x395   :  { %p499_p7 = pnand %p497_p6, %p494_p5 }
 0x397   :  { %502 = shalt.err (!%p499_p7)
}
 0x398   :  { %373 = dma.vmem_to_hbm [thread:$0]  %s371_s0, 16, %s659_s9, [#allocation4]  }
 0x399   :  { %503 = dma.done.wait [#allocation4], 16  }
 0x39a   :  { %504 = vsyncadd [#allocation4], 4294967280 }
 0x39b   :  { %377 = vsyncpa [#allocation4], 1 }

</bundles_post_ra>
